<compile_context>
chip_gen: v5e
topology: v5e:2x2
jax: 0.10.0
libtpu: 0.0.40
codegen_flags: <defaults>
</compile_context>

<pallas_src>
import functools

import jax
import jax.numpy as jnp
from jax.experimental import pallas as pl
from jax.experimental.pallas import tpu as pltpu

_MIB = 1024 * 1024


def _round_up(v, m):
    return (v + m - 1) // m * m


def _vmem_budget_bytes():
    """Generation-aware VMEM budget for the kernel's working set."""
    try:
        phys = pltpu.get_tpu_info().vmem_capacity_bytes
    except Exception:
        phys = 64 * _MIB                      # conservative fallback (v7x per-TC)
    if phys <= 64 * _MIB:
        return 32 * _MIB                      # v7x: 64 MiB per TensorCore
    return 48 * _MIB                          # v5e / v6e: 128 MiB physical


def _choose_tile_n(n_pad, m_pad, jw, k, itemsize, budget_bytes):
    """Largest 128-multiple divisor of N_pad whose full double-buffered working
    set (W tile, P tile, G, Gp, output) fits the budget."""
    def working_set(t):
        w_blk = 2 * jw * t * n_pad * itemsize        # streamed W tile
        p_blk = 2 * t * m_pad * itemsize             # streamed P tile
        g_blk = 2 * jw * n_pad * k * itemsize        # G  (constant across nt)
        gp_blk = 2 * m_pad * k * itemsize            # Gp (constant across nt)
        o_blk = 2 * t * k * 4                        # f32 output tile
        return w_blk + p_blk + g_blk + gp_blk + o_blk

    for t in (t for t in range(n_pad, 127, -128) if n_pad % t == 0):
        if working_set(t) <= budget_bytes:
            return t
    return 128


def _gnn_line_last_kernel(w_ref, g_ref, p_ref, gp_ref, b_ref, o_ref):
    # One (batch, N-tile) grid step.
    #   w_ref : (1, Jw, TILE_N, N_pad)  graph operators, contraction dim LAST (contiguous DMA)
    #   g_ref : (1, Jw, N_pad, K)       per-operator conv_w @ x   (tile-invariant, stays resident)
    #   p_ref : (1, TILE_N, M_pad)      projection rows for this output tile
    #   gp_ref: (1, M_pad, K)           conv_w @ y                (tile-invariant, stays resident)
    #   b_ref : (1, K)                  conv bias (f32)
    #   o_ref : (1, TILE_N, K)          output tile (f32)
    jw = w_ref.shape[1]
    tile_n = o_ref.shape[1]
    k = o_ref.shape[2]

    acc = jnp.zeros((tile_n, k), jnp.float32)
    for j in range(jw):                                   # Jw small & static -> unrolled
        acc = acc + jnp.dot(w_ref[0, j], g_ref[0, j],
                            preferred_element_type=jnp.float32)
    acc = acc + jnp.dot(p_ref[0], gp_ref[0], preferred_element_type=jnp.float32)
    acc = acc + b_ref[...]                                # (1, K) broadcast over rows
    o_ref[0] = acc.astype(o_ref.dtype)


def preprocess_graph_ops(W, P, *, compute_dtype=jnp.float32):
    """One-time layout/cast of the graph operators.

    Call once per forward pass and reuse the result for every gnn layer in the
    stack — this pad/transpose/cast is a full HBM round-trip and must not be
    paid per layer.

    Returns:
      Wc: (B, Jw, N_pad, N_pad)  with the contracted (input-node) dim last.
      Pc: (B, N_pad, M_pad)      P[..., 0] zero-padded (already (N, M) oriented).
    """
    B, N, N2, Jw = W.shape
    assert N == N2
    M = P.shape[2]
    n_pad = _round_up(N, 128)
    m_pad = _round_up(M, 128)
    # TODO(synk): if production N/M are well below 128, pack several batch rows
    # into the 128-lane tile instead of zero-padding (padding inflates streamed
    # W bytes by (128/N)^2 in this bandwidth-bound kernel).
    wc = jnp.transpose(W, (0, 3, 2, 1))                           # (B, Jw, N_out, N_in)
    wc = jnp.pad(wc, ((0, 0), (0, 0), (0, n_pad - N), (0, n_pad - N)))
    pc = jnp.pad(P[..., 0], ((0, 0), (0, n_pad - N), (0, m_pad - M)))
    return wc.astype(compute_dtype), pc.astype(compute_dtype)


def gnn_line_last_apply(Wc, Pc, x, y, conv_w, conv_b):
    """gnn_line_last.forward using pre-laid-out graph ops (preprocess_graph_ops).
    Compute dtype is taken from Wc's dtype."""
    B, Jw, n_pad, _ = Wc.shape
    m_pad = Pc.shape[2]
    F = x.shape[1]
    N = x.shape[2]
    M = y.shape[2]
    K, C_in = conv_w.shape[0], conv_w.shape[1]
    assert C_in == F * (Jw + 1), "conv in_channels must equal num_features*(J+2)"
    cd = Wc.dtype
    itemsize = jnp.dtype(cd).itemsize

    # --- tile-invariant small contractions, done once per call in XLA (tiny) ---
    cw = conv_w[:, :, 0, 0].reshape(K, Jw + 1, F)                 # cw[k, j, f] = w[k, j*F+f]
    g = jnp.einsum('bfn,kjf->bjnk', x[..., 0], cw[:, :Jw, :])     # (B, Jw, N, K)
    g = jnp.pad(g, ((0, 0), (0, 0), (0, n_pad - N), (0, 0))).astype(cd)
    gp = jnp.einsum('bfm,kf->bmk', y[..., 0], cw[:, Jw, :])       # (B, M, K)
    gp = jnp.pad(gp, ((0, 0), (0, m_pad - M), (0, 0))).astype(cd)
    bias = conv_b.reshape(1, K).astype(jnp.float32)

    budget = _vmem_budget_bytes()
    tile_n = _choose_tile_n(n_pad, m_pad, Jw, K, itemsize, int(0.85 * budget))
    grid = (B, n_pad // tile_n)                                   # b outer, nt inner

    out = pl.pallas_call(
        _gnn_line_last_kernel,
        out_shape=jax.ShapeDtypeStruct((B, n_pad, K), jnp.float32),
        grid=grid,
        in_specs=[
            pl.BlockSpec((1, Jw, tile_n, n_pad), lambda b, nt: (b, 0, nt, 0)),  # W (contiguous slabs)
            pl.BlockSpec((1, Jw, n_pad, K), lambda b, nt: (b, 0, 0, 0)),        # G  (constant in nt)
            pl.BlockSpec((1, tile_n, m_pad), lambda b, nt: (b, nt, 0)),         # P rows for this tile
            pl.BlockSpec((1, m_pad, K), lambda b, nt: (b, 0, 0)),               # Gp (constant in nt)
            pl.BlockSpec((1, K), lambda b, nt: (0, 0)),                         # bias
        ],
        out_specs=pl.BlockSpec((1, tile_n, K), lambda b, nt: (b, nt, 0)),
        compiler_params=pltpu.CompilerParams(
            dimension_semantics=("parallel", "parallel"),
            vmem_limit_bytes=budget),
    )(Wc, g, Pc, gp, bias)

    out = out[:, :N, :]                          # drop N padding; already (B, N, K)
    if K == 1:                                   # torch .squeeze(2) only acts if nclasses == 1
        return out[:, :, 0]                      # (B, N)
    return out


def gnn_line_last_forward(W, x, P, y, conv_w, conv_b, *, compute_dtype=jnp.float32):
    """Drop-in equivalent of gnn_line_last.forward((W, x, P, y)).

    In a multi-layer stack, call preprocess_graph_ops once and then
    gnn_line_last_apply per layer so the (W, P) layout pass is not repeated."""
    Wc, Pc = preprocess_graph_ops(W, P, compute_dtype=compute_dtype)
    return gnn_line_last_apply(Wc, Pc, x, y, conv_w, conv_b)


def _reference(W, x, P, y, conv_w, conv_b):
    """Pure-JAX transcription of the PyTorch forward (for verification)."""
    def gmul(Wm, xm):
        J = Wm.shape[3]
        xs = xm[..., 0]                                           # (B, F, A)
        outs = [jnp.einsum('bfa,bac->bfc', xs, Wm[..., j]) for j in range(J)]
        return jnp.concatenate(outs, axis=1)[..., None]           # (B, F*J, C, 1)

    x1 = gmul(W, x)
    x2 = gmul(jnp.transpose(P, (0, 2, 1, 3)), y)
    xc = jnp.concatenate([x1, x2], axis=1)[..., 0]                # (B, C_in, N)
    out = jnp.einsum('kc,bcn->bkn', conv_w[:, :, 0, 0], xc) + conv_b[None, :, None]
    out = jnp.transpose(out, (0, 2, 1))
    if conv_w.shape[0] == 1:
        out = out[..., 0]
    return out


if __name__ == "__main__":
    # Small, self-consistent shapes.
    B, F, N, M = 2, 4, 16, 16
    J = 2                # -> W has J+1 = 3 operator slices; conv in = F*(J+2)
    Jw = J + 1
    K = 2                # nclasses
    C_in = F * (J + 2)

    key = jax.random.PRNGKey(0)
    kW, kx, kP, ky, kcw, kcb = jax.random.split(key, 6)

    W = jax.random.normal(kW, (B, N, N, Jw), dtype=jnp.float32)
    x = jax.random.normal(kx, (B, F, N, 1), dtype=jnp.float32)
    P = jax.random.normal(kP, (B, N, M, 1), dtype=jnp.float32)
    y = jax.random.normal(ky, (B, F, M, 1), dtype=jnp.float32)

    conv_w = 0.1 * jax.random.normal(kcw, (K, C_in, 1, 1), dtype=jnp.float32)
    conv_b = 0.1 * jax.random.normal(kcb, (K,), dtype=jnp.float32)

    ref = _reference(W, x, P, y, conv_w, conv_b)

    # Exact path (default f32 compute) — must match the PyTorch forward tightly.
    fwd_f32 = jax.jit(functools.partial(gnn_line_last_forward, compute_dtype=jnp.float32))
    out_f32 = jax.block_until_ready(fwd_f32(W, x, P, y, conv_w, conv_b))
    assert out_f32.shape == (B, N, K), out_f32.shape
    assert jnp.allclose(out_f32, ref, atol=1e-4, rtol=1e-4), "f32 mismatch vs reference"

    # Stacked-layer usage: preprocess (pad/transpose/cast) once, apply many times (bf16 opt-in).
    prep_bf16 = jax.jit(functools.partial(preprocess_graph_ops, compute_dtype=jnp.bfloat16))
    Wc, Pc = prep_bf16(W, P)
    out_bf16 = jax.block_until_ready(
        jax.jit(gnn_line_last_apply)(Wc, Pc, x, y, conv_w, conv_b))
    assert out_bf16.shape == (B, N, K), out_bf16.shape
    assert jnp.allclose(out_bf16, ref, atol=0.5, rtol=0.1), "bf16 mismatch vs reference"

    print("KERNEL_OK")
</pallas_src>

<mosaic_0001>
module attributes {stable_mosaic.version = 11 : i64} {
  func.func @_gnn_line_last_kernel(%arg0: i32, %arg1: i32, %arg2: memref<1x3x128x128xf32, #tpu.memory_space<vmem>>, %arg3: memref<1x3x128x2xf32, #tpu.memory_space<vmem>>, %arg4: memref<1x128x128xf32, #tpu.memory_space<vmem>>, %arg5: memref<1x128x2xf32, #tpu.memory_space<vmem>>, %arg6: memref<1x2xf32, #tpu.memory_space<vmem>>, %arg7: memref<1x128x2xf32, #tpu.memory_space<vmem>>) attributes {dimension_semantics = [#tpu.dimension_semantics<parallel>, #tpu.dimension_semantics<parallel>], iteration_bounds = array<i64: 2, 1>, scalar_prefetch = 0 : i64, scratch_operands = 0 : i64, tpu.core_type = #tpu.core_type<tc>, window_params = [{transform_indices = @transform_0, window_bounds = array<i64: 1, 3, 128, 128>}, {transform_indices = @transform_1, window_bounds = array<i64: 1, 3, 128, 2>}, {transform_indices = @transform_2, window_bounds = array<i64: 1, 128, 128>}, {transform_indices = @transform_3, window_bounds = array<i64: 1, 128, 2>}, {pipeline_mode = #tpu.pipeline_mode<synchronous>, transform_indices = @transform_4, window_bounds = array<i64: 1, 2>}, {transform_indices = @transform_5, window_bounds = array<i64: 1, 128, 2>}]} {
    %cst = arith.constant 0.000000e+00 : f32
    %0 = vector.broadcast %cst : f32 to vector<128x2xf32>
    %c0 = arith.constant 0 : index
    %c0_0 = arith.constant 0 : index
    %c0_1 = arith.constant 0 : index
    %c0_2 = arith.constant 0 : index
    %1 = vector.load %arg2[%c0, %c0_0, %c0_1, %c0_2] : memref<1x3x128x128xf32, #tpu.memory_space<vmem>>, vector<1x1x128x128xf32>
    %2 = vector.shape_cast %1 : vector<1x1x128x128xf32> to vector<128x128xf32>
    %c0_3 = arith.constant 0 : index
    %c0_4 = arith.constant 0 : index
    %c0_5 = arith.constant 0 : index
    %c0_6 = arith.constant 0 : index
    %3 = vector.load %arg3[%c0_3, %c0_4, %c0_5, %c0_6] : memref<1x3x128x2xf32, #tpu.memory_space<vmem>>, vector<1x1x128x2xf32>
    %4 = vector.shape_cast %3 : vector<1x1x128x2xf32> to vector<128x2xf32>
    %cst_7 = arith.constant dense<0.000000e+00> : vector<128x2xf32>
    %5 = tpu.matmul %2, %4, %cst_7 {dimension_numbers = #tpu.dot_dimension_numbers<[1], [0], [0], [1], [0, 0, 1, 1], [], []>} : vector<128x128xf32>, vector<128x2xf32>, vector<128x2xf32> -> vector<128x2xf32>
    %6 = arith.addf %0, %5 : vector<128x2xf32>
    %c0_8 = arith.constant 0 : index
    %c1 = arith.constant 1 : index
    %c0_9 = arith.constant 0 : index
    %c0_10 = arith.constant 0 : index
    %7 = vector.load %arg2[%c0_8, %c1, %c0_9, %c0_10] : memref<1x3x128x128xf32, #tpu.memory_space<vmem>>, vector<1x1x128x128xf32>
    %8 = vector.shape_cast %7 : vector<1x1x128x128xf32> to vector<128x128xf32>
    %c0_11 = arith.constant 0 : index
    %c1_12 = arith.constant 1 : index
    %c0_13 = arith.constant 0 : index
    %c0_14 = arith.constant 0 : index
    %9 = vector.load %arg3[%c0_11, %c1_12, %c0_13, %c0_14] : memref<1x3x128x2xf32, #tpu.memory_space<vmem>>, vector<1x1x128x2xf32>
    %10 = vector.shape_cast %9 : vector<1x1x128x2xf32> to vector<128x2xf32>
    %cst_15 = arith.constant dense<0.000000e+00> : vector<128x2xf32>
    %11 = tpu.matmul %8, %10, %cst_15 {dimension_numbers = #tpu.dot_dimension_numbers<[1], [0], [0], [1], [0, 0, 1, 1], [], []>} : vector<128x128xf32>, vector<128x2xf32>, vector<128x2xf32> -> vector<128x2xf32>
    %12 = arith.addf %6, %11 : vector<128x2xf32>
    %c0_16 = arith.constant 0 : index
    %c2 = arith.constant 2 : index
    %c0_17 = arith.constant 0 : index
    %c0_18 = arith.constant 0 : index
    %13 = vector.load %arg2[%c0_16, %c2, %c0_17, %c0_18] : memref<1x3x128x128xf32, #tpu.memory_space<vmem>>, vector<1x1x128x128xf32>
    %14 = vector.shape_cast %13 : vector<1x1x128x128xf32> to vector<128x128xf32>
    %c0_19 = arith.constant 0 : index
    %c2_20 = arith.constant 2 : index
    %c0_21 = arith.constant 0 : index
    %c0_22 = arith.constant 0 : index
    %15 = vector.load %arg3[%c0_19, %c2_20, %c0_21, %c0_22] : memref<1x3x128x2xf32, #tpu.memory_space<vmem>>, vector<1x1x128x2xf32>
    %16 = vector.shape_cast %15 : vector<1x1x128x2xf32> to vector<128x2xf32>
    %cst_23 = arith.constant dense<0.000000e+00> : vector<128x2xf32>
    %17 = tpu.matmul %14, %16, %cst_23 {dimension_numbers = #tpu.dot_dimension_numbers<[1], [0], [0], [1], [0, 0, 1, 1], [], []>} : vector<128x128xf32>, vector<128x2xf32>, vector<128x2xf32> -> vector<128x2xf32>
    %18 = arith.addf %12, %17 : vector<128x2xf32>
    %c0_24 = arith.constant 0 : index
    %c0_25 = arith.constant 0 : index
    %c0_26 = arith.constant 0 : index
    %19 = vector.load %arg4[%c0_24, %c0_25, %c0_26] : memref<1x128x128xf32, #tpu.memory_space<vmem>>, vector<1x128x128xf32>
    %20 = vector.shape_cast %19 : vector<1x128x128xf32> to vector<128x128xf32>
    %c0_27 = arith.constant 0 : index
    %c0_28 = arith.constant 0 : index
    %c0_29 = arith.constant 0 : index
    %21 = vector.load %arg5[%c0_27, %c0_28, %c0_29] : memref<1x128x2xf32, #tpu.memory_space<vmem>>, vector<1x128x2xf32>
    %22 = vector.shape_cast %21 : vector<1x128x2xf32> to vector<128x2xf32>
    %cst_30 = arith.constant dense<0.000000e+00> : vector<128x2xf32>
    %23 = tpu.matmul %20, %22, %cst_30 {dimension_numbers = #tpu.dot_dimension_numbers<[1], [0], [0], [1], [0, 0, 1, 1], [], []>} : vector<128x128xf32>, vector<128x2xf32>, vector<128x2xf32> -> vector<128x2xf32>
    %24 = arith.addf %18, %23 : vector<128x2xf32>
    %c0_31 = arith.constant 0 : index
    %c0_32 = arith.constant 0 : index
    %25 = vector.load %arg6[%c0_31, %c0_32] : memref<1x2xf32, #tpu.memory_space<vmem>>, vector<1x2xf32>
    %26 = vector.broadcast %25 : vector<1x2xf32> to vector<128x2xf32>
    %27 = arith.addf %24, %26 : vector<128x2xf32>
    %c0_33 = arith.constant 0 : index
    %c0_34 = arith.constant 0 : index
    %c0_35 = arith.constant 0 : index
    %28 = vector.load %arg7[%c0_33, %c0_34, %c0_35] : memref<1x128x2xf32, #tpu.memory_space<vmem>>, vector<1x128x2xf32>
    %29 = vector.shape_cast %28 : vector<1x128x2xf32> to vector<128x2xf32>
    %30 = vector.shape_cast %27 : vector<128x2xf32> to vector<1x128x2xf32>
    tpu.vector_store %arg7[%c0_33, %c0_34, %c0_35], %30 {strides = array<i32>} : memref<1x128x2xf32, #tpu.memory_space<vmem>>, vector<1x128x2xf32>,
    return
  }
  func.func @transform_0(%arg0: i32, %arg1: i32) -> (i32, i32, i32, i32) {
    %c0_i32 = arith.constant 0 : i32
    %c0_i32_0 = arith.constant 0 : i32
    %c0_i32_1 = arith.constant 0 : i32
    return %arg0, %c0_i32, %arg1, %c0_i32_0 : i32, i32, i32, i32
  }
  func.func @transform_1(%arg0: i32, %arg1: i32) -> (i32, i32, i32, i32) {
    %c0_i32 = arith.constant 0 : i32
    %c0_i32_0 = arith.constant 0 : i32
    %c0_i32_1 = arith.constant 0 : i32
    %c0_i32_2 = arith.constant 0 : i32
    return %arg0, %c0_i32, %c0_i32_0, %c0_i32_1 : i32, i32, i32, i32
  }
  func.func @transform_2(%arg0: i32, %arg1: i32) -> (i32, i32, i32) {
    %c0_i32 = arith.constant 0 : i32
    %c0_i32_0 = arith.constant 0 : i32
    return %arg0, %arg1, %c0_i32 : i32, i32, i32
  }
  func.func @transform_3(%arg0: i32, %arg1: i32) -> (i32, i32, i32) {
    %c0_i32 = arith.constant 0 : i32
    %c0_i32_0 = arith.constant 0 : i32
    %c0_i32_1 = arith.constant 0 : i32
    return %arg0, %c0_i32, %c0_i32_0 : i32, i32, i32
  }
  func.func @transform_4(%arg0: i32, %arg1: i32) -> (i32, i32) {
    %c0_i32 = arith.constant 0 : i32
    %c0_i32_0 = arith.constant 0 : i32
    %c0_i32_1 = arith.constant 0 : i32
    return %c0_i32, %c0_i32_0 : i32, i32
  }
  func.func @transform_5(%arg0: i32, %arg1: i32) -> (i32, i32, i32) {
    %c0_i32 = arith.constant 0 : i32
    %c0_i32_0 = arith.constant 0 : i32
    return %arg0, %arg1, %c0_i32 : i32, i32, i32
  }
}

</mosaic_0001>

<bundles_post_ra>
// kernel: squeeze.6
= control target key start
LH: loop header
LB: loop body
LE: loop exit
PB: predicated region body
PF: predicated region fallthrough
CT: control target
= control target key end

     0   :  { %s44_s8 = smov 116   ;;  %s45_s9 = smov 120   ;;  %vm7_vm0 = vcmask 31744   ;;  %s65_s0 = inlined_call_operand.vmem [shape: f32[2,16], index: 0, kind: input, shape index: {}]   ;;  %s66_s1 = inlined_call_operand.vmem [shape: f32[2,4,4], index: 1, kind: output, shape index: {}]  }
   0x1   :  { %v4_v0 = vld [vmem:[%s65_s0] sm:$0x3]  ;;  %s43_s0 = smov 124  }
   0x2   :  { %5 = vst [vmem:[#allocation1] sm:$0x3] %v4_v0 }
   0x9   :  { %v9_v1 = vld [vmem:[#allocation1] sm:$0x3]  }
   0xa   :  { %v21_v2 = vld [vmem:[#allocation1] sm:$0x3]   ;;  %10 = vrot.lane.b32.xlu0 %v9_v1, %s43_s0 }
   0xb   :  { %22 = vrot.lane.b32.xlu1 %v21_v2, %s44_s8  ;;  %v15_v3 = vld [vmem:[#allocation1] sm:$0x3]  }
   0xc   :  { %v6_v4 = vld [vmem:[#allocation1] sm:$0x3]  }
   0xd   :  { %8 = vst.msk [vmem:[#allocation0] ss:$8 sm:$0x3] %vm7_vm0, %v6_v4  }
  0x12   :  { %16 = vrot.lane.b32.xlu0 %v15_v3, %s45_s9 }
  0x7c   :  { %v11_v5 = vpop.permute.xlu0 %10  }
  0x7d   :  { %v23_v6 = vpop.permute.xlu1 %22   ;;  %14 = vst.msk [vmem:[#allocation0 + $0x1] ss:$8 sm:$0x3] %vm7_vm0, %v11_v5  }
  0x7e   :  { %26 = vst.msk [vmem:[#allocation0 + $0x3] ss:$8 sm:$0x3] %vm7_vm0, %v23_v6  }
  0x84   :  { %v17_v7 = vpop.permute.xlu0 %16  }
  0x85   :  { %20 = vst.msk [vmem:[#allocation0 + $0x2] ss:$8 sm:$0x3] %vm7_vm0, %v17_v7  }
  0x8c   :  { %v29_v8 = vld [vmem:[#allocation0] sm:$0xf]  ;;  %v34_v9 = vld [vmem:[#allocation0 + $0x8] sm:$0xf] }
  0x8d   :  { %32 = vst [vmem:[%s66_s1] sm:$0xf] %v29_v8 }
  0x8e   :  { %39 = vst [vmem:[%s66_s1 + $0x4] sm:$0xf] %v34_v9 }

// kernel: gnn_line_last_forward.1
= control target key start
LH: loop header
LB: loop body
LE: loop exit
PB: predicated region body
PF: predicated region fallthrough
CT: control target
= control target key end

     0   :  { %s1092_s18 = smov 0   ;;  %s1094_s19 = smov 0   ;;  %s1338_s0 = inlined_call_operand.vmem [shape: f32[2,3,128,128], index: 0, kind: input, shape index: {}]   ;;  %s1339_s1 = inlined_call_operand.vmem [shape: f32[2,3,128,2], index: 1, kind: input, shape index: {}]   ;;  %s1340_s2 = inlined_call_operand.vmem [shape: f32[2,128,128], index: 2, kind: input, shape index: {}]   ;;  %s1341_s3 = inlined_call_operand.vmem [shape: f32[2,128,2], index: 3, kind: input, shape index: {}]   ;;  %s1342_s4 = inlined_call_operand.vmem [shape: f32[1,2], index: 4, kind: input, shape index: {}]   ;;  %s1343_s5 = inlined_call_operand.vmem [shape: f32[2,128,2], index: 5, kind: output, shape index: {}]  }
   0x1   :  { %s1096_s20 = smov 0  }
   0x2 LB: > { %s27_s21 = sadd.s32 1, %s1056_s19  ;;  %p934_p0 = scmp.ge.s32.totalorder %s1060_s20, 1  ;;  %s1060_s20 = sphi %s1096_s20, %s15_s20   ;;  %s1056_s19 = sphi %s1094_s19, %s1345_s19   ;;  %s1052_s18 = sphi %s1092_s18, %s1344_s18  }
   0x3   : > { %p29_p1 = scmp.ge.s32.totalorder %s27_s21, 2  ;;  %p245_p2 = scmp.lt.s32.totalorder %s1060_s20, 3 }
   0x5   : > { %s1347_s21 = smov (%p29_p1, %s27_s21), 0  ;;  %p246_p3 = pnand %p934_p0, %p245_p2 }
   0x6   : > { %p301_p4 = scmp.lt.s32.totalorder (!%p246_p3), %s1052_s18, 1 }
   0x7   : > { %249 = sbr.rel (%p246_p3) target bundleno = 307 (0x133), region = 40 }
   0xc   : > { %s1349_s18 = smov (!%p301_p4, %s1052_s18), 1  ;;  %vm784_vm0 = vcmask 15360  }
   0xd   : > { %s1012_s22 = smul.u32 384, %s1349_s18  ;;  %s1114_s23 = sshll.u32 %s1349_s18, 7 }
   0xe   : > { %s1120_s26 = scalar_lea.vmem %s1341_s3, %s1114_s23  ;;  %s1190_s7 = scalar_lea.vmem %s1340_s2, %s1114_s23 }
   0xf   : > { %s1127_s29 = scalar_lea.vmem %s1339_s1, %s1012_s22  ;;  %v682_v0 = vld [vmem:[%s1120_s26 + $0x78] sm:$0xff]  ;;  %v681_v1 = vld [vmem:[%s1120_s26 + $0x70] sm:$0xff]  ;;  %v680_v7 = vld [vmem:[%s1120_s26 + $0x68] sm:$0xff]  ;;  %s1198_s10 = scalar_lea.vmem %s1338_s0, %s1012_s22 }
  0x10   : > { %v1006_v2 = vld [vmem:[%s1127_s29 + $0x178] sm:$0xff]  ;;  %v1005_v3 = vld [vmem:[%s1127_s29 + $0x170] sm:$0xff]  ;;  %683 = vmatpush.msra.mxu3 %v682_v0  ;;  %v1004_v8 = vld [vmem:[%s1127_s29 + $0x168] sm:$0xff]  ;;  %s1279_s15 = scalar_lea.vmem %s1343_s5, %s1114_s23 }
  0x11   : > { %v974_v4 = vld [vmem:[%s1127_s29 + $0xf8] sm:$0xff]  ;;  %570 = vmatpush.msra.mxu2 %v1006_v2  ;;  %v973_v6 = vld [vmem:[%s1127_s29 + $0xf0] sm:$0xff]  ;;  %v972_v10 = vld [vmem:[%s1127_s29 + $0xe8] sm:$0xff] }
  0x12   : > { %406 = vmatpush.msra.mxu0 %v974_v4  ;;  %v371_v5 = vld [vmem:[%s1127_s29 + $0x78] sm:$0xff]  ;;  %684 = vmatpush.msra.mxu3 %v681_v1  ;;  %v370_v9 = vld [vmem:[%s1127_s29 + $0x70] sm:$0xff]  ;;  %v369_v11 = vld [vmem:[%s1127_s29 + $0x68] sm:$0xff] }
  0x13   : > { %471 = vmatpush.msra.mxu1 %v371_v5  ;;  %571 = vmatpush.msra.mxu2 %v1005_v3  ;;  %v679_v12 = vld [vmem:[%s1120_s26 + $0x60] sm:$0xff]  ;;  %v678_v16 = vld [vmem:[%s1120_s26 + $0x58] sm:$0xff]  ;;  %v677_v20 = vld [vmem:[%s1120_s26 + $0x50] sm:$0xff] }
  0x14   : > { %407 = vmatpush.msra.mxu0 %v973_v6  ;;  %v1003_v13 = vld [vmem:[%s1127_s29 + $0x160] sm:$0xff]  ;;  %685 = vmatpush.msra.mxu3 %v680_v7  ;;  %v1002_v17 = vld [vmem:[%s1127_s29 + $0x158] sm:$0xff]  ;;  %v1001_v21 = vld [vmem:[%s1127_s29 + $0x150] sm:$0xff] }
  0x15   : > { %472 = vmatpush.msra.mxu1 %v370_v9  ;;  %v971_v14 = vld [vmem:[%s1127_s29 + $0xe0] sm:$0xff]  ;;  %572 = vmatpush.msra.mxu2 %v1004_v8  ;;  %v970_v18 = vld [vmem:[%s1127_s29 + $0xd8] sm:$0xff]  ;;  %v969_v22 = vld [vmem:[%s1127_s29 + $0xd0] sm:$0xff] }
  0x16   : > { %408 = vmatpush.msra.mxu0 %v972_v10  ;;  %v368_v15 = vld [vmem:[%s1127_s29 + $0x60] sm:$0xff]  ;;  %686 = vmatpush.msra.mxu3 %v679_v12  ;;  %v367_v19 = vld [vmem:[%s1127_s29 + $0x58] sm:$0xff]  ;;  %v366_v23 = vld [vmem:[%s1127_s29 + $0x50] sm:$0xff] }
  0x17   : > { %473 = vmatpush.msra.mxu1 %v369_v11  ;;  %573 = vmatpush.msra.mxu2 %v1003_v13  ;;  %v676_v24 = vld [vmem:[%s1120_s26 + $0x48] sm:$0xff]  ;;  %v675_v28 = vld [vmem:[%s1120_s26 + $0x40] sm:$0xff]  ;;  %v674_v32 = vld [vmem:[%s1120_s26 + $0x38] sm:$0xff] }
  0x18   : > { %409 = vmatpush.msra.mxu0 %v971_v14  ;;  %687 = vmatpush.msra.mxu3 %v678_v16  ;;  %v1000_v25 = vld [vmem:[%s1127_s29 + $0x148] sm:$0xff]  ;;  %v999_v29 = vld [vmem:[%s1127_s29 + $0x140] sm:$0xff]  ;;  %v998_v33 = vld [vmem:[%s1127_s29 + $0x138] sm:$0xff] }
  0x19   : > { %474 = vmatpush.msra.mxu1 %v368_v15  ;;  %574 = vmatpush.msra.mxu2 %v1002_v17  ;;  %v968_v26 = vld [vmem:[%s1127_s29 + $0xc8] sm:$0xff]  ;;  %v967_v30 = vld [vmem:[%s1127_s29 + $0xc0] sm:$0xff]  ;;  %v966_v34 = vld [vmem:[%s1127_s29 + $0xb8] sm:$0xff] }
  0x1a   : > { %410 = vmatpush.msra.mxu0 %v970_v18  ;;  %688 = vmatpush.msra.mxu3 %v677_v20  ;;  %v365_v27 = vld [vmem:[%s1127_s29 + $0x48] sm:$0xff]  ;;  %v364_v31 = vld [vmem:[%s1127_s29 + $0x40] sm:$0xff]  ;;  %v363_v35 = vld [vmem:[%s1127_s29 + $0x38] sm:$0xff] }
  0x1b   : > { %475 = vmatpush.msra.mxu1 %v367_v19  ;;  %575 = vmatpush.msra.mxu2 %v1001_v21  ;;  %v673_v36 = vld [vmem:[%s1120_s26 + $0x30] sm:$0xff]  ;;  %v672_v40 = vld [vmem:[%s1120_s26 + $0x28] sm:$0xff]  ;;  %v671_v44 = vld [vmem:[%s1120_s26 + $0x20] sm:$0xff] }
  0x1c   : > { %411 = vmatpush.msra.mxu0 %v969_v22  ;;  %689 = vmatpush.msra.mxu3 %v676_v24  ;;  %v997_v37 = vld [vmem:[%s1127_s29 + $0x130] sm:$0xff]  ;;  %v996_v41 = vld [vmem:[%s1127_s29 + $0x128] sm:$0xff]  ;;  %v995_v45 = vld [vmem:[%s1127_s29 + $0x120] sm:$0xff] }
  0x1d   : > { %476 = vmatpush.msra.mxu1 %v366_v23  ;;  %576 = vmatpush.msra.mxu2 %v1000_v25  ;;  %v965_v38 = vld [vmem:[%s1127_s29 + $0xb0] sm:$0xff]  ;;  %v964_v42 = vld [vmem:[%s1127_s29 + $0xa8] sm:$0xff]  ;;  %v963_v46 = vld [vmem:[%s1127_s29 + $0xa0] sm:$0xff] }
  0x1e   : > { %412 = vmatpush.msra.mxu0 %v968_v26  ;;  %690 = vmatpush.msra.mxu3 %v675_v28  ;;  %v362_v39 = vld [vmem:[%s1127_s29 + $0x30] sm:$0xff]  ;;  %v361_v43 = vld [vmem:[%s1127_s29 + $0x28] sm:$0xff]  ;;  %v360_v47 = vld [vmem:[%s1127_s29 + $0x20] sm:$0xff] }
  0x1f   : > { %477 = vmatpush.msra.mxu1 %v365_v27  ;;  %577 = vmatpush.msra.mxu2 %v999_v29  ;;  %v670_v48 = vld [vmem:[%s1120_s26 + $0x18] sm:$0xff]  ;;  %v669_v52 = vld [vmem:[%s1120_s26 + $0x10] sm:$0xff]  ;;  %v668_v56 = vld [vmem:[%s1120_s26 + $0x8] sm:$0xff] }
  0x20   : > { %413 = vmatpush.msra.mxu0 %v967_v30  ;;  %691 = vmatpush.msra.mxu3 %v674_v32  ;;  %v994_v49 = vld [vmem:[%s1127_s29 + $0x118] sm:$0xff]  ;;  %v993_v53 = vld [vmem:[%s1127_s29 + $0x110] sm:$0xff]  ;;  %v992_v57 = vld [vmem:[%s1127_s29 + $0x108] sm:$0xff] }
  0x21   : > { %478 = vmatpush.msra.mxu1 %v364_v31  ;;  %578 = vmatpush.msra.mxu2 %v998_v33  ;;  %v962_v50 = vld [vmem:[%s1127_s29 + $0x98] sm:$0xff]  ;;  %v961_v54 = vld [vmem:[%s1127_s29 + $0x90] sm:$0xff]  ;;  %v960_v58 = vld [vmem:[%s1127_s29 + $0x88] sm:$0xff] }
  0x22   : > { %414 = vmatpush.msra.mxu0 %v966_v34  ;;  %692 = vmatpush.msra.mxu3 %v673_v36  ;;  %v359_v51 = vld [vmem:[%s1127_s29 + $0x18] sm:$0xff]  ;;  %v358_v55 = vld [vmem:[%s1127_s29 + $0x10] sm:$0xff]  ;;  %v357_v59 = vld [vmem:[%s1127_s29 + $0x8] sm:$0xff] }
  0x23   : > { %479 = vmatpush.msra.mxu1 %v363_v35  ;;  %579 = vmatpush.msra.mxu2 %v997_v37  ;;  %v667_v60 = vld [vmem:[%s1120_s26] sm:$0xff]  ;;  %v652_v4 = vld [vmem:[%s1190_s7 + $0x8] sm:$0xff]  ;;  %v653_v8 = vld [vmem:[%s1190_s7 + $0x10] sm:$0xff] }
  0x24   : > { %415 = vmatpush.msra.mxu0 %v965_v38  ;;  %693 = vmatpush.msra.mxu3 %v672_v40  ;;  %v991_v61 = vld [vmem:[%s1127_s29 + $0x100] sm:$0xff]  ;;  %v976_v5 = vld [vmem:[%s1198_s10 + $0x108] sm:$0xff]  ;;  %v977_v9 = vld [vmem:[%s1198_s10 + $0x110] sm:$0xff] }
  0x25   : > { %480 = vmatpush.msra.mxu1 %v362_v39  ;;  %580 = vmatpush.msra.mxu2 %v996_v41  ;;  %v651_v62 = vld [vmem:[%s1190_s7] sm:$0xff]  ;;  %v944_v6 = vld [vmem:[%s1198_s10 + $0x88] sm:$0xff]  ;;  %v945_v10 = vld [vmem:[%s1198_s10 + $0x90] sm:$0xff] }
  0x26   : > { %416 = vmatpush.msra.mxu0 %v964_v42  ;;  %694 = vmatpush.msra.mxu3 %v671_v44  ;;  %v975_v63 = vld [vmem:[%s1198_s10 + $0x100] sm:$0xff]  ;;  %v341_v7 = vld [vmem:[%s1198_s10 + $0x8] sm:$0xff]  ;;  %v342_v11 = vld [vmem:[%s1198_s10 + $0x10] sm:$0xff] }
  0x27   : > { %481 = vmatpush.msra.mxu1 %v361_v43  ;;  %581 = vmatpush.msra.mxu2 %v995_v45  ;;  %v959_v0 = vld [vmem:[%s1127_s29 + $0x80] sm:$0xff]  ;;  %v654_v12 = vld [vmem:[%s1190_s7 + $0x18] sm:$0xff]  ;;  %v656_v20 = vld [vmem:[%s1190_s7 + $0x28] sm:$0xff] }
  0x28   : > { %417 = vmatpush.msra.mxu0 %v963_v46  ;;  %695 = vmatpush.msra.mxu3 %v670_v48  ;;  %v356_v1 = vld [vmem:[%s1127_s29] sm:$0xff]  ;;  %v978_v13 = vld [vmem:[%s1198_s10 + $0x118] sm:$0xff]  ;;  %v980_v21 = vld [vmem:[%s1198_s10 + $0x128] sm:$0xff] }
  0x29   : > { %482 = vmatpush.msra.mxu1 %v360_v47  ;;  %582 = vmatpush.msra.mxu2 %v994_v49  ;;  %v943_v2 = vld [vmem:[%s1198_s10 + $0x80] sm:$0xff]  ;;  %v946_v14 = vld [vmem:[%s1198_s10 + $0x98] sm:$0xff]  ;;  %v948_v22 = vld [vmem:[%s1198_s10 + $0xa8] sm:$0xff] }
  0x2a   : > { %418 = vmatpush.msra.mxu0 %v962_v50  ;;  %696 = vmatpush.msra.mxu3 %v669_v52  ;;  %v340_v3 = vld [vmem:[%s1198_s10] sm:$0xff]  ;;  %v343_v15 = vld [vmem:[%s1198_s10 + $0x18] sm:$0xff]  ;;  %v345_v23 = vld [vmem:[%s1198_s10 + $0x28] sm:$0xff] }
  0x2b   : > { %483 = vmatpush.msra.mxu1 %v359_v51  ;;  %583 = vmatpush.msra.mxu2 %v993_v53  ;;  %v655_v16 = vld [vmem:[%s1190_s7 + $0x20] sm:$0xff]  ;;  %v657_v24 = vld [vmem:[%s1190_s7 + $0x30] sm:$0xff]  ;;  %v658_v28 = vld [vmem:[%s1190_s7 + $0x38] sm:$0xff] }
  0x2c   : > { %419 = vmatpush.msra.mxu0 %v961_v54  ;;  %697 = vmatpush.msra.mxu3 %v668_v56  ;;  %v979_v17 = vld [vmem:[%s1198_s10 + $0x120] sm:$0xff]  ;;  %v981_v25 = vld [vmem:[%s1198_s10 + $0x130] sm:$0xff]  ;;  %v982_v29 = vld [vmem:[%s1198_s10 + $0x138] sm:$0xff] }
  0x2d   : > { %484 = vmatpush.msra.mxu1 %v358_v55  ;;  %584 = vmatpush.msra.mxu2 %v992_v57  ;;  %v947_v18 = vld [vmem:[%s1198_s10 + $0xa0] sm:$0xff]  ;;  %v949_v26 = vld [vmem:[%s1198_s10 + $0xb0] sm:$0xff]  ;;  %v950_v30 = vld [vmem:[%s1198_s10 + $0xb8] sm:$0xff] }
  0x2e   : > { %420 = vmatpush.msra.mxu0 %v960_v58  ;;  %698 = vmatpush.msra.mxu3 %v667_v60  ;;  %v344_v19 = vld [vmem:[%s1198_s10 + $0x20] sm:$0xff]  ;;  %v346_v27 = vld [vmem:[%s1198_s10 + $0x30] sm:$0xff]  ;;  %v347_v31 = vld [vmem:[%s1198_s10 + $0x38] sm:$0xff] }
  0x2f   : > { %485 = vmatpush.msra.mxu1 %v357_v59  ;;  %585 = vmatpush.msra.mxu2 %v991_v61  ;;  %v659_v32 = vld [vmem:[%s1190_s7 + $0x40] sm:$0xff]  ;;  %v660_v36 = vld [vmem:[%s1190_s7 + $0x48] sm:$0xff]  ;;  %v661_v40 = vld [vmem:[%s1190_s7 + $0x50] sm:$0xff] }
  0x30   : > { %699 = vmatmul.f32.vlgmr.msra.gmra.mxu3 %v651_v62  ;;  %586 = vmatmul.f32.vlgmr.msra.gmra.mxu2 %v975_v63  ;;  %v983_v33 = vld [vmem:[%s1198_s10 + $0x140] sm:$0xff]  ;;  %v984_v37 = vld [vmem:[%s1198_s10 + $0x148] sm:$0xff]  ;;  %v985_v41 = vld [vmem:[%s1198_s10 + $0x150] sm:$0xff] }
  0x31   : > { %421 = vmatpush.msra.mxu0 %v959_v0  ;;  %486 = vmatpush.msra.mxu1 %v356_v1  ;;  %v951_v34 = vld [vmem:[%s1198_s10 + $0xc0] sm:$0xff]  ;;  %v952_v38 = vld [vmem:[%s1198_s10 + $0xc8] sm:$0xff]  ;;  %v953_v42 = vld [vmem:[%s1198_s10 + $0xd0] sm:$0xff] }
  0x32   : > { %422 = vmatmul.f32.vlgmr.msra.gmra.mxu0 %v943_v2  ;;  %487 = vmatmul.f32.vlgmr.msra.gmra.mxu1 %v340_v3  ;;  %v348_v35 = vld [vmem:[%s1198_s10 + $0x40] sm:$0xff]  ;;  %v349_v39 = vld [vmem:[%s1198_s10 + $0x48] sm:$0xff]  ;;  %v350_v43 = vld [vmem:[%s1198_s10 + $0x50] sm:$0xff] }
  0x33   : > { %v662_v44 = vld [vmem:[%s1190_s7 + $0x58] sm:$0xff]  ;;  %v663_v48 = vld [vmem:[%s1190_s7 + $0x60] sm:$0xff]  ;;  %v664_v52 = vld [vmem:[%s1190_s7 + $0x68] sm:$0xff] }
  0x34   : > { %v986_v45 = vld [vmem:[%s1198_s10 + $0x158] sm:$0xff]  ;;  %v987_v49 = vld [vmem:[%s1198_s10 + $0x160] sm:$0xff]  ;;  %v988_v53 = vld [vmem:[%s1198_s10 + $0x168] sm:$0xff] }
  0x35   : > { %v954_v46 = vld [vmem:[%s1198_s10 + $0xd8] sm:$0xff]  ;;  %v955_v50 = vld [vmem:[%s1198_s10 + $0xe0] sm:$0xff]  ;;  %v956_v54 = vld [vmem:[%s1198_s10 + $0xe8] sm:$0xff] }
  0x36   : > { %v351_v47 = vld [vmem:[%s1198_s10 + $0x58] sm:$0xff]  ;;  %v352_v51 = vld [vmem:[%s1198_s10 + $0x60] sm:$0xff]  ;;  %v353_v55 = vld [vmem:[%s1198_s10 + $0x68] sm:$0xff] }
  0x37   : > { %v665_v56 = vld [vmem:[%s1190_s7 + $0x70] sm:$0xff]  ;;  %v666_v60 = vld [vmem:[%s1190_s7 + $0x78] sm:$0xff] }
  0x38   : > { %702 = vmatmul.f32.gmra.mxu3 %v652_v4  ;;  %589 = vmatmul.f32.gmra.mxu2 %v976_v5  ;;  %v989_v57 = vld [vmem:[%s1198_s10 + $0x170] sm:$0xff]  ;;  %v990_v61 = vld [vmem:[%s1198_s10 + $0x178] sm:$0xff] }
  0x39   : > { %v957_v58 = vld [vmem:[%s1198_s10 + $0xf0] sm:$0xff]  ;;  %v958_v62 = vld [vmem:[%s1198_s10 + $0xf8] sm:$0xff] }
  0x3a   : > { %425 = vmatmul.f32.gmra.mxu0 %v944_v6  ;;  %490 = vmatmul.f32.gmra.mxu1 %v341_v7  ;;  %v354_v59 = vld [vmem:[%s1198_s10 + $0x70] sm:$0xff]  ;;  %v355_v63 = vld [vmem:[%s1198_s10 + $0x78] sm:$0xff]  ;;  %v1273_v6 = vld [vmem:[%s1342_s4] ss:$0 sm:$0xff] }
  0x40   : > { %705 = vmatmul.f32.gmra.mxu3 %v653_v8  ;;  %592 = vmatmul.f32.gmra.mxu2 %v977_v9 }
  0x42   : > { %428 = vmatmul.f32.gmra.mxu0 %v945_v10  ;;  %493 = vmatmul.f32.gmra.mxu1 %v342_v11 }
  0x48   : > { %708 = vmatmul.f32.gmra.mxu3 %v654_v12  ;;  %595 = vmatmul.f32.gmra.mxu2 %v978_v13 }
  0x4a   : > { %431 = vmatmul.f32.gmra.mxu0 %v946_v14  ;;  %496 = vmatmul.f32.gmra.mxu1 %v343_v15 }
  0x50   : > { %711 = vmatmul.f32.gmra.mxu3 %v655_v16  ;;  %598 = vmatmul.f32.gmra.mxu2 %v979_v17 }
  0x52   : > { %434 = vmatmul.f32.gmra.mxu0 %v947_v18  ;;  %499 = vmatmul.f32.gmra.mxu1 %v344_v19 }
  0x58   : > { %714 = vmatmul.f32.gmra.mxu3 %v656_v20  ;;  %601 = vmatmul.f32.gmra.mxu2 %v980_v21 }
  0x5a   : > { %437 = vmatmul.f32.gmra.mxu0 %v948_v22  ;;  %502 = vmatmul.f32.gmra.mxu1 %v345_v23 }
  0x60   : > { %717 = vmatmul.f32.gmra.mxu3 %v657_v24  ;;  %604 = vmatmul.f32.gmra.mxu2 %v981_v25 }
  0x62   : > { %440 = vmatmul.f32.gmra.mxu0 %v949_v26  ;;  %505 = vmatmul.f32.gmra.mxu1 %v346_v27 }
  0x68   : > { %720 = vmatmul.f32.gmra.mxu3 %v658_v28  ;;  %607 = vmatmul.f32.gmra.mxu2 %v982_v29 }
  0x6a   : > { %443 = vmatmul.f32.gmra.mxu0 %v950_v30  ;;  %508 = vmatmul.f32.gmra.mxu1 %v347_v31 }
  0x70   : > { %723 = vmatmul.f32.gmra.mxu3 %v659_v32  ;;  %610 = vmatmul.f32.gmra.mxu2 %v983_v33 }
  0x72   : > { %446 = vmatmul.f32.gmra.mxu0 %v951_v34  ;;  %511 = vmatmul.f32.gmra.mxu1 %v348_v35 }
  0x78   : > { %726 = vmatmul.f32.gmra.mxu3 %v660_v36  ;;  %613 = vmatmul.f32.gmra.mxu2 %v984_v37 }
  0x7a   : > { %449 = vmatmul.f32.gmra.mxu0 %v952_v38  ;;  %514 = vmatmul.f32.gmra.mxu1 %v349_v39 }
  0x80   : > { %729 = vmatmul.f32.gmra.mxu3 %v661_v40  ;;  %616 = vmatmul.f32.gmra.mxu2 %v985_v41 }
  0x82   : > { %452 = vmatmul.f32.gmra.mxu0 %v953_v42  ;;  %517 = vmatmul.f32.gmra.mxu1 %v350_v43 }
  0x88   : > { %732 = vmatmul.f32.gmra.mxu3 %v662_v44  ;;  %619 = vmatmul.f32.gmra.mxu2 %v986_v45 }
  0x8a   : > { %455 = vmatmul.f32.gmra.mxu0 %v954_v46  ;;  %520 = vmatmul.f32.gmra.mxu1 %v351_v47 }
  0x90   : > { %735 = vmatmul.f32.gmra.mxu3 %v663_v48  ;;  %622 = vmatmul.f32.gmra.mxu2 %v987_v49 }
  0x92   : > { %458 = vmatmul.f32.gmra.mxu0 %v955_v50  ;;  %523 = vmatmul.f32.gmra.mxu1 %v352_v51 }
  0x98   : > { %738 = vmatmul.f32.gmra.mxu3 %v664_v52  ;;  %625 = vmatmul.f32.gmra.mxu2 %v988_v53 }
  0x9a   : > { %461 = vmatmul.f32.gmra.mxu0 %v956_v54  ;;  %526 = vmatmul.f32.gmra.mxu1 %v353_v55 }
  0xa0   : > { %741 = vmatmul.f32.gmra.mxu3 %v665_v56  ;;  %628 = vmatmul.f32.gmra.mxu2 %v989_v57 }
  0xa2   : > { %464 = vmatmul.f32.gmra.mxu0 %v957_v58  ;;  %529 = vmatmul.f32.gmra.mxu1 %v354_v59 }
  0xa8   : > { %744 = vmatmul.f32.gmra.mxu3 %v666_v60  ;;  %631 = vmatmul.f32.gmra.mxu2 %v990_v61 }
  0xaa   : > { %467 = vmatmul.f32.gmra.mxu0 %v958_v62  ;;  %532 = vmatmul.f32.gmra.mxu1 %v355_v63 }
  0xaf   : > { %v423_v0 = vpop.f32.mrf.mxu0  ;;  %v488_v1 = vpop.f32.mrf.mxu1 }
  0xb0   : > { %v489_v2 = vadd.f32 %v488_v1, %v423_v0 }
  0xb3   : > { %v700_v3 = vpop.f32.mrf.mxu3  ;;  %v587_v4 = vpop.f32.mrf.mxu2 }
  0xb4   : > { %v635_v5 = vadd.f32 %v587_v4, %v489_v2 }
  0xb6   : > { %v748_v7 = vadd.f32 %v700_v3, %v635_v5 }
  0xb7   : > { %v426_v8 = vpop.f32.mrf.mxu0  ;;  %v491_v9 = vpop.f32.mrf.mxu1 }
  0xb8   : > { %v768_v10 = vadd.f32 %v1273_v6, %v748_v7  ;;  %v492_v11 = vadd.f32 %v491_v9, %v426_v8 }
  0xba   : > { %785 = vst.msk [vmem:[%s1279_s15] sm:$0xff] %vm784_vm0, %v768_v10 }
  0xbb   : > { %v703_v12 = vpop.f32.mrf.mxu3  ;;  %v590_v13 = vpop.f32.mrf.mxu2 }
  0xbc   : > { %v636_v14 = vadd.f32 %v590_v13, %v492_v11 }
  0xbe   : > { %v749_v15 = vadd.f32 %v703_v12, %v636_v14 }
  0xbf   : > { %v429_v16 = vpop.f32.mrf.mxu0  ;;  %v494_v17 = vpop.f32.mrf.mxu1 }
  0xc0   : > { %v769_v18 = vadd.f32 %v1273_v6, %v749_v15  ;;  %v495_v19 = vadd.f32 %v494_v17, %v429_v16 }
  0xc2   : > { %786 = vst.msk [vmem:[%s1279_s15 + $0x8] sm:$0xff] %vm784_vm0, %v769_v18 }
  0xc3   : > { %v706_v20 = vpop.f32.mrf.mxu3  ;;  %v593_v21 = vpop.f32.mrf.mxu2 }
  0xc4   : > { %v637_v22 = vadd.f32 %v593_v21, %v495_v19 }
  0xc6   : > { %v750_v23 = vadd.f32 %v706_v20, %v637_v22 }
  0xc7   : > { %v432_v24 = vpop.f32.mrf.mxu0  ;;  %v497_v25 = vpop.f32.mrf.mxu1 }
  0xc8   : > { %v770_v26 = vadd.f32 %v1273_v6, %v750_v23  ;;  %v498_v27 = vadd.f32 %v497_v25, %v432_v24 }
  0xca   : > { %787 = vst.msk [vmem:[%s1279_s15 + $0x10] sm:$0xff] %vm784_vm0, %v770_v26 }
  0xcb   : > { %v709_v28 = vpop.f32.mrf.mxu3  ;;  %v596_v29 = vpop.f32.mrf.mxu2 }
  0xcc   : > { %v638_v30 = vadd.f32 %v596_v29, %v498_v27 }
  0xce   : > { %v751_v31 = vadd.f32 %v709_v28, %v638_v30 }
  0xcf   : > { %v435_v32 = vpop.f32.mrf.mxu0  ;;  %v500_v33 = vpop.f32.mrf.mxu1 }
  0xd0   : > { %v771_v34 = vadd.f32 %v1273_v6, %v751_v31  ;;  %v501_v35 = vadd.f32 %v500_v33, %v435_v32 }
  0xd2   : > { %788 = vst.msk [vmem:[%s1279_s15 + $0x18] sm:$0xff] %vm784_vm0, %v771_v34 }
  0xd3   : > { %v712_v36 = vpop.f32.mrf.mxu3  ;;  %v599_v37 = vpop.f32.mrf.mxu2 }
  0xd4   : > { %v639_v38 = vadd.f32 %v599_v37, %v501_v35 }
  0xd6   : > { %v752_v39 = vadd.f32 %v712_v36, %v639_v38 }
  0xd7   : > { %v438_v40 = vpop.f32.mrf.mxu0  ;;  %v503_v41 = vpop.f32.mrf.mxu1 }
  0xd8   : > { %v772_v42 = vadd.f32 %v1273_v6, %v752_v39  ;;  %v504_v43 = vadd.f32 %v503_v41, %v438_v40 }
  0xda   : > { %789 = vst.msk [vmem:[%s1279_s15 + $0x20] sm:$0xff] %vm784_vm0, %v772_v42 }
  0xdb   : > { %v715_v44 = vpop.f32.mrf.mxu3  ;;  %v602_v45 = vpop.f32.mrf.mxu2 }
  0xdc   : > { %v640_v46 = vadd.f32 %v602_v45, %v504_v43 }
  0xde   : > { %v753_v47 = vadd.f32 %v715_v44, %v640_v46 }
  0xdf   : > { %v441_v48 = vpop.f32.mrf.mxu0  ;;  %v506_v49 = vpop.f32.mrf.mxu1 }
  0xe0   : > { %v773_v50 = vadd.f32 %v1273_v6, %v753_v47  ;;  %v507_v51 = vadd.f32 %v506_v49, %v441_v48 }
  0xe2   : > { %790 = vst.msk [vmem:[%s1279_s15 + $0x28] sm:$0xff] %vm784_vm0, %v773_v50 }
  0xe3   : > { %v718_v52 = vpop.f32.mrf.mxu3  ;;  %v605_v53 = vpop.f32.mrf.mxu2 }
  0xe4   : > { %v641_v54 = vadd.f32 %v605_v53, %v507_v51 }
  0xe6   : > { %v754_v55 = vadd.f32 %v718_v52, %v641_v54 }
  0xe7   : > { %v444_v56 = vpop.f32.mrf.mxu0  ;;  %v509_v57 = vpop.f32.mrf.mxu1 }
  0xe8   : > { %v774_v58 = vadd.f32 %v1273_v6, %v754_v55  ;;  %v510_v59 = vadd.f32 %v509_v57, %v444_v56 }
  0xea   : > { %791 = vst.msk [vmem:[%s1279_s15 + $0x30] sm:$0xff] %vm784_vm0, %v774_v58 }
  0xeb   : > { %v721_v60 = vpop.f32.mrf.mxu3  ;;  %v608_v61 = vpop.f32.mrf.mxu2 }
  0xec   : > { %v642_v62 = vadd.f32 %v608_v61, %v510_v59 }
  0xee   : > { %v755_v63 = vadd.f32 %v721_v60, %v642_v62 }
  0xef   : > { %v447_v0 = vpop.f32.mrf.mxu0  ;;  %v512_v1 = vpop.f32.mrf.mxu1 }
  0xf0   : > { %v775_v2 = vadd.f32 %v1273_v6, %v755_v63  ;;  %v513_v3 = vadd.f32 %v512_v1, %v447_v0 }
  0xf2   : > { %792 = vst.msk [vmem:[%s1279_s15 + $0x38] sm:$0xff] %vm784_vm0, %v775_v2 }
  0xf3   : > { %v724_v4 = vpop.f32.mrf.mxu3  ;;  %v611_v5 = vpop.f32.mrf.mxu2 }
  0xf4   : > { %v643_v7 = vadd.f32 %v611_v5, %v513_v3 }
  0xf6   : > { %v756_v8 = vadd.f32 %v724_v4, %v643_v7 }
  0xf7   : > { %v450_v9 = vpop.f32.mrf.mxu0  ;;  %v515_v10 = vpop.f32.mrf.mxu1 }
  0xf8   : > { %v776_v11 = vadd.f32 %v1273_v6, %v756_v8  ;;  %v516_v12 = vadd.f32 %v515_v10, %v450_v9 }
  0xfa   : > { %793 = vst.msk [vmem:[%s1279_s15 + $0x40] sm:$0xff] %vm784_vm0, %v776_v11 }
  0xfb   : > { %v727_v13 = vpop.f32.mrf.mxu3  ;;  %v614_v14 = vpop.f32.mrf.mxu2 }
  0xfc   : > { %v644_v15 = vadd.f32 %v614_v14, %v516_v12 }
  0xfe   : > { %v757_v16 = vadd.f32 %v727_v13, %v644_v15 }
  0xff   : > { %v453_v17 = vpop.f32.mrf.mxu0  ;;  %v518_v18 = vpop.f32.mrf.mxu1 }
 0x100   : > { %v777_v19 = vadd.f32 %v1273_v6, %v757_v16  ;;  %v519_v20 = vadd.f32 %v518_v18, %v453_v17 }
 0x102   : > { %794 = vst.msk [vmem:[%s1279_s15 + $0x48] sm:$0xff] %vm784_vm0, %v777_v19 }
 0x103   : > { %v730_v21 = vpop.f32.mrf.mxu3  ;;  %v617_v22 = vpop.f32.mrf.mxu2 }
 0x104   : > { %v645_v23 = vadd.f32 %v617_v22, %v519_v20 }
 0x106   : > { %v758_v24 = vadd.f32 %v730_v21, %v645_v23 }
 0x107   : > { %v456_v25 = vpop.f32.mrf.mxu0  ;;  %v521_v26 = vpop.f32.mrf.mxu1 }
 0x108   : > { %v778_v27 = vadd.f32 %v1273_v6, %v758_v24  ;;  %v522_v28 = vadd.f32 %v521_v26, %v456_v25 }
 0x10a   : > { %795 = vst.msk [vmem:[%s1279_s15 + $0x50] sm:$0xff] %vm784_vm0, %v778_v27 }
 0x10b   : > { %v733_v29 = vpop.f32.mrf.mxu3  ;;  %v620_v30 = vpop.f32.mrf.mxu2 }
 0x10c   : > { %v646_v31 = vadd.f32 %v620_v30, %v522_v28 }
 0x10e   : > { %v759_v32 = vadd.f32 %v733_v29, %v646_v31 }
 0x10f   : > { %v459_v33 = vpop.f32.mrf.mxu0  ;;  %v524_v34 = vpop.f32.mrf.mxu1 }
 0x110   : > { %v779_v35 = vadd.f32 %v1273_v6, %v759_v32  ;;  %v525_v36 = vadd.f32 %v524_v34, %v459_v33 }
 0x112   : > { %796 = vst.msk [vmem:[%s1279_s15 + $0x58] sm:$0xff] %vm784_vm0, %v779_v35 }
 0x113   : > { %v736_v37 = vpop.f32.mrf.mxu3  ;;  %v623_v38 = vpop.f32.mrf.mxu2 }
 0x114   : > { %v647_v39 = vadd.f32 %v623_v38, %v525_v36 }
 0x116   : > { %v760_v40 = vadd.f32 %v736_v37, %v647_v39 }
 0x117   : > { %v462_v41 = vpop.f32.mrf.mxu0  ;;  %v527_v42 = vpop.f32.mrf.mxu1 }
 0x118   : > { %v780_v43 = vadd.f32 %v1273_v6, %v760_v40  ;;  %v528_v44 = vadd.f32 %v527_v42, %v462_v41 }
 0x11a   : > { %797 = vst.msk [vmem:[%s1279_s15 + $0x60] sm:$0xff] %vm784_vm0, %v780_v43 }
 0x11b   : > { %v739_v45 = vpop.f32.mrf.mxu3  ;;  %v626_v46 = vpop.f32.mrf.mxu2 }
 0x11c   : > { %v648_v47 = vadd.f32 %v626_v46, %v528_v44 }
 0x11e   : > { %v761_v48 = vadd.f32 %v739_v45, %v648_v47 }
 0x11f   : > { %v465_v49 = vpop.f32.mrf.mxu0  ;;  %v530_v50 = vpop.f32.mrf.mxu1 }
 0x120   : > { %v781_v51 = vadd.f32 %v1273_v6, %v761_v48  ;;  %v531_v52 = vadd.f32 %v530_v50, %v465_v49 }
 0x122   : > { %798 = vst.msk [vmem:[%s1279_s15 + $0x68] sm:$0xff] %vm784_vm0, %v781_v51 }
 0x123   : > { %v742_v53 = vpop.f32.mrf.mxu3  ;;  %v629_v54 = vpop.f32.mrf.mxu2 }
 0x124   : > { %v649_v55 = vadd.f32 %v629_v54, %v531_v52 }
 0x126   : > { %v762_v56 = vadd.f32 %v742_v53, %v649_v55 }
 0x127   : > { %v468_v57 = vpop.f32.mrf.mxu0  ;;  %v533_v58 = vpop.f32.mrf.mxu1 }
 0x128   : > { %v782_v59 = vadd.f32 %v1273_v6, %v762_v56  ;;  %v534_v60 = vadd.f32 %v533_v58, %v468_v57 }
 0x12a   : > { %799 = vst.msk [vmem:[%s1279_s15 + $0x70] sm:$0xff] %vm784_vm0, %v782_v59 }
 0x12b   : > { %v632_v61 = vpop.f32.mrf.mxu2  ;;  %v745_v62 = vpop.f32.mrf.mxu3 }
 0x12c   : > { %v650_v63 = vadd.f32 %v632_v61, %v534_v60 }
 0x12e   : > { %v763_v0 = vadd.f32 %v745_v62, %v650_v63 }
 0x130   : > { %v783_v1 = vadd.f32 %v1273_v6, %v763_v0 }
 0x132   : > { %800 = vst.msk [vmem:[%s1279_s15 + $0x78] sm:$0xff] %vm784_vm0, %v783_v1 }
 0x133 PF: > { %s15_s20 = sadd.s32 1, %s1060_s20   ;;  %s1344_s18 = smov %s1056_s19 }
 0x134   : > { %p12_p5 = scmp.ge.s32.totalorder %s15_s20, 4   ;;  %s1345_s19 = smov %s1347_s21 }
 0x136   :  { %14 = sbr.rel (!%p12_p5) target bundleno = 2 (0x2), region = 83 }

</bundles_post_ra>
